<compile_context>
chip_gen: v7x
topology: tpu7x:2x2x1
jax: 0.10.0
libtpu: 0.0.40
codegen_flags: <defaults>
</compile_context>

<pallas_src>
import jax
import jax.numpy as jnp
from jax.experimental import pallas as pl
from jax.experimental.pallas import tpu as pltpu  # noqa: F401  (kept for TPU-specific params)


def attention_kernel(enc_ref, dec_ref, w_ref, wt_ref, b_ref, out_ref):
    # enc_ref: [B, S, E]   dec_ref: [B, D]
    # w_ref:   [D, E]      wt_ref:  [E, D]     b_ref: [1, D]
    # out_ref: [B, D]
    enc = enc_ref[...].astype(jnp.float32)          # [B, S, E]
    h = dec_ref[...].astype(jnp.float32)            # [B, D]

    # v[b, e] = sum_d h[b, d] * W[d, e]   (== W^T h)
    v = jnp.dot(h, w_ref[...], preferred_element_type=jnp.float32)          # [B, E]

    # logits[b, s] = enc[b, s, :] . v[b, :]
    # (the bias . h term is constant along s and cancels in the softmax)
    logits = jnp.sum(enc * v[:, None, :], axis=-1)                            # [B, S]

    # Softmax over the sequence axis (lane-major, vectorized over batch).
    m = jnp.max(logits, axis=-1, keepdims=True)                               # [B, 1]
    e = jnp.exp(logits - m)                                                   # [B, S]
    denom = jnp.sum(e, axis=-1, keepdims=True)                                # [B, 1]
    scores = e * pl.reciprocal(denom, approx=False)                           # [B, S]

    # ctx[b, e] = sum_s scores[b, s] * enc[b, s, e]
    ctx = jnp.sum(scores[:, :, None] * enc, axis=1)                           # [B, E]

    # out[b, d] = ctx[b, :] @ W^T + bias   (softmax weights sum to 1 -> bias once)
    out = jnp.dot(ctx, wt_ref[...], preferred_element_type=jnp.float32) + b_ref[...]
    out_ref[...] = out.astype(out_ref.dtype)                                  # [B, D]


def attention_pallas(encoder_states, decoder_hidden, weight, bias):
    """encoder_states: [B, S, enc_dim], decoder_hidden: [1, B, dec_dim],
    weight: [dec_dim, enc_dim] (PyTorch Linear layout), bias: [dec_dim].
    Returns [B, 1, dec_dim]."""
    B, S, enc_dim = encoder_states.shape
    dec_dim = weight.shape[0]

    dec = decoder_hidden[0]                    # [B, dec_dim]
    w_t = weight.T                             # [enc_dim, dec_dim]
    b2 = bias.reshape(1, dec_dim)              # [1, dec_dim]

    # Single grid step: the whole (small) problem fits comfortably in VMEM; all
    # operands are fetched once and the result is one lane-dense [B, dec_dim] store.
    # TODO(synk): for very large S/B, tile the sequence/batch with a grid and an
    # online softmax instead of the single-block formulation below.
    out2d = pl.pallas_call(
        attention_kernel,
        out_shape=jax.ShapeDtypeStruct((B, dec_dim), encoder_states.dtype),
        in_specs=[
            pl.BlockSpec((B, S, enc_dim), lambda: (0, 0, 0)),
            pl.BlockSpec((B, dec_dim), lambda: (0, 0)),
            pl.BlockSpec((dec_dim, enc_dim), lambda: (0, 0)),
            pl.BlockSpec((enc_dim, dec_dim), lambda: (0, 0)),
            pl.BlockSpec((1, dec_dim), lambda: (0, 0)),
        ],
        out_specs=pl.BlockSpec((B, dec_dim), lambda: (0, 0)),
    )(encoder_states, dec, weight, w_t, b2)

    return out2d.reshape(B, 1, dec_dim)


def attention_reference(encoder_states, decoder_hidden, weight, bias):
    """Pure-JAX mirror of the PyTorch forward, for validation."""
    proj = jnp.einsum("bse,de->bsd", encoder_states, weight) + bias       # [B,S,dec]
    dh = jnp.transpose(decoder_hidden, (1, 2, 0))                          # [B,dec,1]
    logits = jnp.matmul(proj, dh)[..., 0]                                  # [B,S]
    scores = jax.nn.softmax(logits, axis=1)[..., None]                     # [B,S,1]
    weighted = jnp.matmul(jnp.transpose(proj, (0, 2, 1)), scores)          # [B,dec,1]
    return jnp.transpose(weighted, (0, 2, 1))                              # [B,1,dec]


if __name__ == "__main__":
    B, S, enc_dim, dec_dim = 2, 8, 32, 32

    key = jax.random.PRNGKey(0)
    k1, k2, k3, k4 = jax.random.split(key, 4)

    encoder_states = jax.random.normal(k1, (B, S, enc_dim), dtype=jnp.float32)
    decoder_hidden = jax.random.normal(k2, (1, B, dec_dim), dtype=jnp.float32)
    # Deterministic Linear params (PyTorch layout: weight [dec_dim, enc_dim]).
    weight = jax.random.normal(k3, (dec_dim, enc_dim), dtype=jnp.float32) * 0.1
    bias = jax.random.normal(k4, (dec_dim,), dtype=jnp.float32) * 0.1

    out = attention_pallas(encoder_states, decoder_hidden, weight, bias)
    out = jax.block_until_ready(out)

    ref = attention_reference(encoder_states, decoder_hidden, weight, bias)
    assert out.shape == (B, 1, dec_dim), out.shape
    # Slightly relaxed tolerance: the refactored math changes FP association
    # (logits and the bias contribution) at the ~1e-6 level.
    assert jnp.allclose(out, ref, atol=1e-4, rtol=1e-4), (
        float(jnp.max(jnp.abs(out - ref))))

    print("KERNEL_OK")
</pallas_src>

<mosaic_0001>
module attributes {stable_mosaic.version = 11 : i64} {
  func.func @attention_kernel(%arg0: memref<2x8x32xf32, #tpu.memory_space<vmem>>, %arg1: memref<2x32xf32, #tpu.memory_space<vmem>>, %arg2: memref<32x32xf32, #tpu.memory_space<vmem>>, %arg3: memref<32x32xf32, #tpu.memory_space<vmem>>, %arg4: memref<1x32xf32, #tpu.memory_space<vmem>>, %arg5: memref<2x32xf32, #tpu.memory_space<vmem>>) attributes {dimension_semantics = [], scalar_prefetch = 0 : i64, scratch_operands = 0 : i64, tpu.core_type = #tpu.core_type<tc>} {
    %c0 = arith.constant 0 : index
    %c0_0 = arith.constant 0 : index
    %c0_1 = arith.constant 0 : index
    %0 = vector.load %arg0[%c0, %c0_0, %c0_1] : memref<2x8x32xf32, #tpu.memory_space<vmem>>, vector<2x8x32xf32>
    %c0_2 = arith.constant 0 : index
    %c0_3 = arith.constant 0 : index
    %1 = vector.load %arg1[%c0_2, %c0_3] : memref<2x32xf32, #tpu.memory_space<vmem>>, vector<2x32xf32>
    %c0_4 = arith.constant 0 : index
    %c0_5 = arith.constant 0 : index
    %2 = vector.load %arg2[%c0_4, %c0_5] : memref<32x32xf32, #tpu.memory_space<vmem>>, vector<32x32xf32>
    %cst = arith.constant dense<0.000000e+00> : vector<2x32xf32>
    %3 = tpu.matmul %1, %2, %cst {dimension_numbers = #tpu.dot_dimension_numbers<[1], [0], [0], [1], [0, 0, 1, 1], [], []>} : vector<2x32xf32>, vector<32x32xf32>, vector<2x32xf32> -> vector<2x32xf32>
    %4 = vector.shape_cast %3 : vector<2x32xf32> to vector<2x1x32xf32>
    %5 = vector.broadcast %4 : vector<2x1x32xf32> to vector<2x8x32xf32>
    %6 = arith.mulf %0, %5 : vector<2x8x32xf32>
    %cst_6 = arith.constant dense<0.000000e+00> : vector<2x8xf32>
    %7 = vector.multi_reduction <add>, %6, %cst_6 [2] : vector<2x8x32xf32> to vector<2x8xf32>
    %cst_7 = arith.constant dense<0xFF800000> : vector<2xf32>
    %8 = vector.multi_reduction <maximumf>, %7, %cst_7 [1] : vector<2x8xf32> to vector<2xf32>
    %9 = vector.shape_cast %8 : vector<2xf32> to vector<2x1xf32>
    %10 = vector.broadcast %9 : vector<2x1xf32> to vector<2x8xf32>
    %11 = arith.subf %7, %10 : vector<2x8xf32>
    %12 = math.exp %11 : vector<2x8xf32>
    %cst_8 = arith.constant dense<0.000000e+00> : vector<2xf32>
    %13 = vector.multi_reduction <add>, %12, %cst_8 [1] : vector<2x8xf32> to vector<2xf32>
    %14 = vector.shape_cast %13 : vector<2xf32> to vector<2x1xf32>
    %15 = tpu.reciprocal %14 : vector<2x1xf32> -> vector<2x1xf32>
    %16 = vector.broadcast %15 : vector<2x1xf32> to vector<2x8xf32>
    %17 = arith.mulf %12, %16 : vector<2x8xf32>
    %18 = vector.shape_cast %17 : vector<2x8xf32> to vector<2x8x1xf32>
    %19 = vector.broadcast %18 : vector<2x8x1xf32> to vector<2x8x32xf32>
    %20 = arith.mulf %19, %0 : vector<2x8x32xf32>
    %cst_9 = arith.constant dense<0.000000e+00> : vector<2x32xf32>
    %21 = vector.multi_reduction <add>, %20, %cst_9 [1] : vector<2x8x32xf32> to vector<2x32xf32>
    %c0_10 = arith.constant 0 : index
    %c0_11 = arith.constant 0 : index
    %22 = vector.load %arg3[%c0_10, %c0_11] : memref<32x32xf32, #tpu.memory_space<vmem>>, vector<32x32xf32>
    %cst_12 = arith.constant dense<0.000000e+00> : vector<2x32xf32>
    %23 = tpu.matmul %21, %22, %cst_12 {dimension_numbers = #tpu.dot_dimension_numbers<[1], [0], [0], [1], [0, 0, 1, 1], [], []>} : vector<2x32xf32>, vector<32x32xf32>, vector<2x32xf32> -> vector<2x32xf32>
    %c0_13 = arith.constant 0 : index
    %c0_14 = arith.constant 0 : index
    %24 = vector.load %arg4[%c0_13, %c0_14] : memref<1x32xf32, #tpu.memory_space<vmem>>, vector<1x32xf32>
    %25 = vector.broadcast %24 : vector<1x32xf32> to vector<2x32xf32>
    %26 = arith.addf %23, %25 : vector<2x32xf32>
    %c0_15 = arith.constant 0 : index
    %c0_16 = arith.constant 0 : index
    %27 = vector.load %arg5[%c0_15, %c0_16] : memref<2x32xf32, #tpu.memory_space<vmem>>, vector<2x32xf32>
    tpu.vector_store %arg5[%c0_15, %c0_16], %26 {strides = array<i32>} : memref<2x32xf32, #tpu.memory_space<vmem>>, vector<2x32xf32>,
    return
  }
}

</mosaic_0001>

<bundles_post_ra>
// kernel: tpu_custom_call.1
= control target key start
LH: loop header
LB: loop body
LE: loop exit
PB: predicated region body
PF: predicated region fallthrough
CT: control target
= control target key end

     0   :  { %10 = vsyncpa [#allocation3], 0  ;;  %s679_s0 = inlined_call_operand.hbm [shape: f32[2,8,32], index: 0, kind: input, shape index: {}]   ;;  %s680_s1 = inlined_call_operand.vmem [shape: f32[2,32], index: 1, kind: input, shape index: {}]   ;;  %s681_s2 = inlined_call_operand.hbm [shape: f32[32,32], index: 2, kind: input, shape index: {}]   ;;  %s682_s3 = inlined_call_operand.hbm [shape: f32[32,32], index: 3, kind: input, shape index: {}]   ;;  %s683_s4 = inlined_call_operand.vmem [shape: f32[1,32], index: 4, kind: input, shape index: {}]   ;;  %s684_s5 = inlined_call_operand.hbm [shape: f32[2,32], index: 5, kind: output, shape index: {}]  }
   0x1   :  { %11 = vsyncpa [#allocation6], 0 }
   0x2   :  { %12 = vsyncpa [#allocation4], 0  ;;  %s545_s18 = smov [#allocation5]   ;;  %s546_s20 = smov [#allocation2]  }
   0x3   :  { %s32_s19 = sshll.u32 %s545_s18, 4  ;;  %s18_s21 = sshll.u32 %s546_s20, 4  ;;  %s33_s19 = int_to_ptr.vmem [resolvable:$true] %s32_s19  ;;  %s586_s21 = int_to_ptr.vmem [resolvable:$true] %s18_s21 }
   0x4   :  { %s451_s24 = scalar_lea.hbm %s681_s2, 512 }
   0x5   :  { %p452_p0 = scmp.ne.s32.totalorder %s681_s2, %s451_s24  ;;  %p455_p1 = scmp.lt.u32.totalorder %s451_s24, %s681_s2 }
   0x7   :  { %p457_p2 = pnand %p455_p1, %p452_p0 }
   0x9   :  { %460 = shalt.err (!%p457_p2)
}
   0xa   :  { %s461_s29 = scalar_lea.vmem %s33_s19, 512  ;;  %p466_p4 = scmp.lt.s32.totalorder %s33_s19, %s33_s19 }
   0xb   :  { %p462_p3 = scmp.ne.s32.totalorder %s33_s19, %s461_s29  ;;  %p467_p5 = scmp.lt.s32.totalorder %s461_s29, %s461_s29 }
   0xd   :  { %p468_p6 = por %p467_p5, %p466_p4 }
   0xf   :  { %p469_p7 = pnand %p468_p6, %p462_p3 }
  0x11   :  { %472 = shalt.err (!%p469_p7)
}
  0x12   :  { %s547_s30 = smov 128   ;;  %s548_s6 = smov 8  }
  0x13   :  { %38 = dma.hbm_to_vmem [thread:$0]  %s681_s2, 512, %s33_s19, [#allocation6], %s547_s30, %s547_s30, %s548_s6  }
  0x14   :  { %s473_s11 = scalar_lea.hbm %s679_s0, 256 }
  0x15   :  { %p474_p8 = scmp.ne.s32.totalorder %s679_s0, %s473_s11  ;;  %p477_p9 = scmp.lt.u32.totalorder %s473_s11, %s679_s0 }
  0x17   :  { %p479_p10 = pnand %p477_p9, %p474_p8 }
  0x19   :  { %482 = shalt.err (!%p479_p10)
}
  0x1a   :  { %s483_s16 = scalar_lea.vmem %s586_s21, 256  ;;  %p488_p12 = scmp.lt.s32.totalorder %s586_s21, %s586_s21 }
  0x1b   :  { %p484_p11 = scmp.ne.s32.totalorder %s586_s21, %s483_s16  ;;  %p489_p13 = scmp.lt.s32.totalorder %s483_s16, %s483_s16 }
  0x1d   :  { %p490_p0 = por %p489_p13, %p488_p12 }
  0x1f   :  { %p491_p1 = pnand %p490_p0, %p484_p11 }
  0x21   :  { %494 = shalt.err (!%p491_p1)
}
  0x22   :  { %24 = dma.hbm_to_vmem [thread:$0]  %s679_s0, 256, %s586_s21, [#allocation3], %s547_s30, %s547_s30, %s548_s6  }
  0x23   :  { %s549_s18 = smov [#allocation7]   ;;  %s495_s23 = scalar_lea.hbm %s682_s3, 512 }
  0x24   :  { %s44_s19 = sshll.u32 %s549_s18, 4  ;;  %p496_p2 = scmp.ne.s32.totalorder %s682_s3, %s495_s23  ;;  %s45_s19 = int_to_ptr.vmem [resolvable:$true] %s44_s19 }
  0x25   :  { %p499_p3 = scmp.lt.u32.totalorder %s495_s23, %s682_s3 }
  0x27   :  { %p501_p4 = pnand %p499_p3, %p496_p2 }
  0x29   :  { %504 = shalt.err (!%p501_p4)
}
  0x2a   :  { %s505_s28 = scalar_lea.vmem %s45_s19, 512  ;;  %p510_p6 = scmp.lt.s32.totalorder %s45_s19, %s45_s19 }
  0x2b   :  { %p506_p5 = scmp.ne.s32.totalorder %s45_s19, %s505_s28  ;;  %p511_p7 = scmp.lt.s32.totalorder %s505_s28, %s505_s28 }
  0x2d   :  { %p512_p8 = por %p511_p7, %p510_p6 }
  0x2f   :  { %p513_p9 = pnand %p512_p8, %p506_p5 }
  0x31   :  { %516 = shalt.err (!%p513_p9)
}
  0x32   :  { %50 = dma.hbm_to_vmem [thread:$0]  %s682_s3, 512, %s45_s19, [#allocation6], %s547_s30, %s547_s30, %s548_s6  }
  0x33   :  { %539 = dma.done.wait [#allocation3], 256  }
  0x34   :  { %540 = vsyncadd [#allocation3], 4294967040 }
  0x35   :  { %541 = dma.done.wait [#allocation6], 1024  }
  0x36   :  { %542 = vsyncadd [#allocation6], 4294966272  ;;  %v550_v0 = vmov 0.0|0.0   ;;  %vm551_vm0 = vmmov 0   ;;  %v552_v1 = vmov 0.0   ;;  %v65_v2 = vld [vmem:[#allocation5] sm:$0xff]  ;;  %v147_v11 = vlaneseq }
  0x37   :  { %420 = vmatprep.subr.bf16.mxu0 %v550_v0  ;;  %406 = vmatprep.mubr.msk.f32.mxu0 %vm551_vm0, %v552_v1  ;;  %v66_v3 = vld [vmem:[#allocation5 + $0x8] sm:$0xff]  ;;  %v67_v4 = vld [vmem:[#allocation5 + $0x10] sm:$0xff]  ;;  %v68_v6 = vld [vmem:[#allocation5 + $0x18] sm:$0xff]  ;;  %vm69_vm1 = vcmask 261120   ;;  %v553_v9 = vmov 1966171168  }
  0x38   :  { %426 = vmatprep.subr.bf16.mxu1 %v550_v0  ;;  %417 = vmatprep.mubr.msk.f32.mxu1 %vm551_vm0, %v552_v1  ;;  %v421_v5 = vpack.c.bf16 %v66_v3, %v65_v2  ;;  %v424_v7 = vpack.c.bf16 %v68_v6, %v67_v4  ;;  %v64_v8 = vld [vmem:[%s680_s1] sm:$0x3]  ;;  %v145_v10 = vunpack.c.l.s4 %v553_v9  ;;  %v148_v13 = vshrl.u32 %v147_v11, 7  ;;  %v647_v24 = vld [vmem:[#allocation2 + $0x8] sm:$0xff]  ;;  %v281_v61 = vld [vmem:[#allocation7] sm:$0xff]  ;;  %s555_s6 = smov [#allocation8]  }
  0x39   :  { %v645_v21 = vld [vmem:[#allocation2] sm:$0xff]  ;;  %v187_v30 = vand.u32 127, %v147_v11  ;;  %vm196_vm2 = vcmask 1041409   ;;  %vm199_vm3 = vcmask 58368   ;;  %v554_v38 = vmov 0   ;;  %v282_v62 = vld [vmem:[#allocation7 + $0x8] sm:$0xff] }
  0x3a   :  { %422 = vmatpush3.bf16.msra.mxu0 %v421_v5  ;;  %v146_v12 = vunpack.c.0.s8 %v145_v10  ;;  %v168_v18 = vsub.s32 0, %v148_v13  ;;  %444 = vset.pattern.permute.xlu0 %v554_v38  ;;  %v210_v39 = vsub.s32 1, %v148_v13  ;;  %v427_v63 = vpack.c.bf16 %v282_v62, %v281_v61  ;;  %v283_v1 = vld [vmem:[#allocation7 + $0x10] sm:$0xff]  ;;  %v284_v2 = vld [vmem:[#allocation7 + $0x18] sm:$0xff]  ;;  %s375_s7 = sshll.u32 %s555_s6, 4  ;;  %s376_s7 = int_to_ptr.vmem [resolvable:$true] %s375_s7 }
  0x3b   :  { %423 = vmatprep.subr.bf16.mxu0 %v550_v0  ;;  %v190_v32 = vsub.s32 %v187_v30, %v148_v13  ;;  %443 = vset.pattern.permute.xlu1 %v554_v38  ;;  %v430_v3 = vpack.c.bf16 %v284_v2, %v283_v1  ;;  %vm367_vm4 = vcmask 254976   ;;  %s517_s8 = scalar_lea.vmem %s376_s7, 32  ;;  %p522_p11 = scmp.lt.s32.totalorder %s376_s7, %s376_s7 }
  0x3c   :  { %v149_v14 = vsub.s32 %v146_v12, %v148_v13  ;;  %428 = vmatpush3.bf16.msra.mxu1 %v427_v63  ;;  %p518_p10 = scmp.ne.s32.totalorder %s376_s7, %s517_s8  ;;  %p523_p12 = scmp.lt.s32.totalorder %s517_s8, %s517_s8 }
  0x3d   :  { %429 = vmatprep.subr.bf16.mxu1 %v550_v0 }
  0x3e   :  { %425 = vmatpush3.bf16.msra.mxu0 %v424_v7  ;;  %p524_p13 = por %p523_p12, %p522_p11 }
  0x40   :  { %431 = vmatpush3.bf16.msra.mxu1 %v430_v3  ;;  %p525_p0 = pnand %p524_p13, %p518_p10 }
  0x41   :  { %407 = vmatmul.mubr.msk.f32.vlgmr.msra.gmra.mrb[0].mxu0 %vm69_vm1, %v64_v8 }
 0x114   :  { %v139_v15 = vpop.f32.mrb[0].mxu0 }
 0x115   :  { %v150_v16 = vrot.slane %v139_v15, %v149_v14  ;;  %v408_v17 = vpop.f32.mrb[1].mxu0 }
 0x117   :  { %v151_v19 = vcombine.high %v150_v16, %v150_v16  ;;  %v158_v20 = vrot.slane %v150_v16, %v149_v14 }
 0x119   :  { %v165_v22 = vrot.slane %v151_v19, %v149_v14  ;;  %v169_v23 = vrot.slane %v158_v20, %v168_v18 }
 0x11b   :  { %v176_v25 = vmul.f32 %v169_v23, %v645_v21  ;;  %v173_v26 = vrot.slane %v165_v22, %v168_v18  ;;  %v386_v22 = vld [vmem:[%s683_s4] ss:$0 sm:$0xff] }
 0x11d   :  { %v178_v27 = vsel %vm69_vm1, %v176_v25, 0.0  ;;  %v177_v28 = vmul.f32 %v173_v26, %v647_v24 }
 0x11e   :  { %179 = vadd.xlane.f32.xlu0 %v178_v27 }
 0x11f   :  { %v181_v29 = vsel %vm69_vm1, %v177_v28, 0.0 }
 0x122   :  { %182 = vadd.xlane.f32.xlu0 %v181_v29 }
 0x1ab   :  { %v180_v31 = vpop.xlane.xlu0 %179 }
 0x1ac   :  { %v191_v34 = vrot.slane %v180_v31, %v190_v32 }
 0x1af   :  { %v183_v33 = vpop.xlane.xlu0 %182 }
 0x1b0   :  { %v195_v35 = vrot.slane %v183_v33, %v190_v32 }
 0x1b2   :  { %v197_v36 = vsel %vm196_vm2, %v195_v35, %v191_v34 }
 0x1b3   :  { %v200_v37 = vsel %vm199_vm3, %v197_v36, -inf }
 0x1b4   :  { %201 = vmax.xlane.f32.xlu1 %v200_v37 }
 0x241   :  { %v202_v40 = vpop.xlane.xlu1 %201 }
 0x242   :  { %v207_v41 = vrot.slane %v202_v40, %v168_v18  ;;  %v211_v42 = vrot.slane %v202_v40, %v210_v39 }
 0x244   :  { %v214_v43 = vsub.f32 %v180_v31, %v207_v41  ;;  %v215_v44 = vsub.f32 %v183_v33, %v211_v42 }
 0x246   :  { %v216_v45 = vmul.f32 1.442695, %v214_v43  ;;  %v218_v46 = vmul.f32 1.442695, %v215_v44 }
 0x248   :  { %445 = vpow2.f32 %v216_v45 }
 0x249   :  { %447 = vpow2.f32 %v218_v46 }
 0x252   :  { %v446_v47 = vpop.eup %445 }
 0x253   :  { %v448_v48 = vpop.eup %447  ;;  %223 = vperm.xlu1 %443, %v446_v47  }
 0x254   :  { %226 = vperm.xlu0 %444, %v448_v48  }
 0x2d2   :  { %v224_v49 = vpop.permute.xlu1 %223 }
 0x2d3   :  { %v227_v50 = vpop.permute.xlu0 %226  ;;  %v231_v51 = vrot.slane %v224_v49, %v190_v32 }
 0x2d4   :  { %v235_v52 = vrot.slane %v227_v50, %v190_v32 }
 0x2d6   :  { %v236_v53 = vsel %vm196_vm2, %v235_v52, %v231_v51 }
 0x2d7   :  { %v238_v54 = vsel %vm199_vm3, %v236_v53, 0.0 }
 0x2d8   :  { %239 = vadd.xlane.f32.xlu1 %v238_v54 }
 0x365   :  { %v240_v55 = vpop.xlane.xlu1 %239 }
 0x366   :  { %449 = vrcp.f32 %v240_v55 }
 0x370   :  { %v450_v56 = vpop.eup %449 }
 0x371   :  { %v246_v57 = vrot.slane %v450_v56, %v168_v18  ;;  %v250_v59 = vrot.slane %v450_v56, %v210_v39 }
 0x373   :  { %v253_v58 = vmul.f32 %v446_v47, %v246_v57  ;;  %v254_v60 = vmul.f32 %v448_v48, %v250_v59 }
 0x375   :  { %257 = vperm.xlu0 %444, %v253_v58  }
 0x379   :  { %262 = vperm.xlu0 %444, %v254_v60  }
 0x3f4   :  { %v258_v4 = vpop.permute.xlu0 %257 }
 0x3f5   :  { %v265_v5 = vmul.f32 %v258_v4, %v645_v21 }
 0x3f7   :  { %v267_v6 = vsel %vm69_vm1, %v265_v5, 0.0 }
 0x3f8   :  { %v268_v7 = vrot.slane %v267_v6, 4  ;;  %v263_v8 = vpop.permute.xlu0 %262 }
 0x3f9   :  { %v266_v9 = vmul.f32 %v263_v8, %v647_v24 }
 0x3fa   :  { %v269_v10 = vadd.f32 %v268_v7, %v267_v6 }
 0x3fb   :  { %v274_v11 = vsel %vm69_vm1, %v266_v9, 0.0 }
 0x3fc   :  { %v270_v12 = vrot.slane %v269_v10, 2  ;;  %v275_v13 = vrot.slane %v274_v11, 4 }
 0x3fe   :  { %v271_v14 = vadd.f32 %v270_v12, %v269_v10  ;;  %v276_v0 = vadd.f32 %v275_v13, %v274_v11 }
 0x400   :  { %v277_v15 = vrot.slane %v276_v0, 2  ;;  %v272_v16 = vrot.slane %v271_v14, 1 }
 0x402   :  { %v278_v17 = vadd.f32 %v277_v15, %v276_v0  ;;  %v273_v19 = vadd.f32 %v272_v16, %v271_v14 }
 0x404   :  { %v279_v18 = vrot.slane %v278_v17, 1 }
 0x406   :  { %v280_v20 = vadd.f32 %v279_v18, %v278_v17 }
 0x408   :  { %v294_v21 = vsel %vm196_vm2, %v280_v20, %v273_v19 }
 0x409   :  { %418 = vmatmul.mubr.msk.f32.vlgmr.msra.gmra.mrb[0].mxu1 %vm69_vm1, %v294_v21 }
 0x4dc   :  { %v363_v23 = vpop.f32.mrb[0].mxu1 }
 0x4dd   :  { %v364_v24 = vadd.f32 %v386_v22, %v363_v23  ;;  %v419_v25 = vpop.f32.mrb[1].mxu1 }
 0x4df   :  { %368 = vst.msk [vmem:[#allocation8] sm:$0x3] %vm367_vm4, %v364_v24 }
 0x4e0   :  { %528 = shalt.err (!%p525_p0)
}
 0x4e1   :  { %s529_s11 = scalar_lea.hbm %s684_s5, 32 }
 0x4e2   :  { %p530_p1 = scmp.ne.s32.totalorder %s684_s5, %s529_s11  ;;  %p533_p2 = scmp.lt.u32.totalorder %s529_s11, %s684_s5 }
 0x4e4   :  { %p535_p3 = pnand %p533_p2, %p530_p1 }
 0x4e6   :  { %538 = shalt.err (!%p535_p3)
}
 0x4e7   :  { %378 = dma.vmem_to_hbm [thread:$0]  %s376_s7, 32, %s684_s5, [#allocation4]  }
 0x4e8   :  { %543 = dma.done.wait [#allocation4], 32  }
 0x4e9   :  { %544 = vsyncadd [#allocation4], 4294967264 }
 0x4ea   :  { %382 = vsyncpa [#allocation3], 1 }
 0x4eb   :  { %383 = vsyncpa [#allocation6], 1 }
 0x4ec   :  { %384 = vsyncpa [#allocation4], 1 }

</bundles_post_ra>
